<compile_context>
chip_gen: v7x
topology: tpu7x:2x2x1
jax: 0.10.0
libtpu: 0.0.40
codegen_flags: <defaults>
</compile_context>

<pallas_src>
import jax
import jax.numpy as jnp
from jax.experimental import pallas as pl
from jax.experimental.pallas import tpu as pltpu


def _mlp_kernel(x_ref, w1t_ref, b1t_ref, w2t_ref, w3t_ref, w4t_ref, wot_ref,
                o_ref):
    """Fused 5-layer MLP, activations kept lane-dense as (hidden, tile_b)."""
    x = x_ref[...]                                             # (tile_b, F)

    # Layer 1: contract the feature axes of w1^T (17, F) and x (tile_b, F)
    # -> (17, tile_b).  Row 16 of w1^T is zero and b1t[16] == 1, so after the
    # bias add + ReLU the last row is a constant 1.0 "ones row" that carries
    # the biases of the remaining layers through the matmuls.
    h = jax.lax.dot_general(
        w1t_ref[...], x,
        dimension_numbers=(((1,), (1,)), ((), ())),
        preferred_element_type=jnp.float32)
    h = jnp.maximum(h + b1t_ref[...], 0.0)                     # (17, tile_b)

    # Layers 2-4: bias lives in the last column of the transposed augmented
    # weight; the ones row re-creates itself (0*h + 1 -> ReLU -> 1).
    h = jnp.maximum(
        jnp.dot(w2t_ref[...], h, preferred_element_type=jnp.float32), 0.0)  # (33, tile_b)
    h = jnp.maximum(
        jnp.dot(w3t_ref[...], h, preferred_element_type=jnp.float32), 0.0)  # (17, tile_b)
    h = jnp.maximum(
        jnp.dot(w4t_ref[...], h, preferred_element_type=jnp.float32), 0.0)  # (17, tile_b)

    # Output layer: (1, 17) @ (17, tile_b) -> (1, tile_b), natively lane-dense.
    out = jnp.dot(wot_ref[...], h, preferred_element_type=jnp.float32)
    o_ref[...] = out.astype(o_ref.dtype)


def _augment_params(params):
    """Fold biases into transposed, augmented weights (see kernel docstring)."""
    w1, b1 = params["w1"], params["b1"]          # (F, 16), (1, 16)
    w2, b2 = params["w2"], params["b2"]          # (16, 32), (1, 32)
    w3, b3 = params["w3"], params["b3"]          # (32, 16), (1, 16)
    w4, b4 = params["w4"], params["b4"]          # (16, 16), (1, 16)
    wo, bo = params["wo"], params["bo"]          # (16, 1),  (1, 1)
    f = w1.shape[0]

    # Layer 1: extra hidden unit with weight 0 / bias 1 -> constant ones row.
    w1t = jnp.concatenate([w1, jnp.zeros((f, 1), w1.dtype)], axis=1).T   # (17, F)
    b1t = jnp.concatenate([b1, jnp.ones((1, 1), b1.dtype)], axis=1).T    # (17, 1)

    def aug_hidden_t(w, b):
        i, _ = w.shape
        top = jnp.concatenate([w, jnp.zeros((i, 1), w.dtype)], axis=1)
        bot = jnp.concatenate([b, jnp.ones((1, 1), b.dtype)], axis=1)
        return jnp.concatenate([top, bot], axis=0).T           # (out+1, in+1)

    w2t = aug_hidden_t(w2, b2)                                  # (33, 17)
    w3t = aug_hidden_t(w3, b3)                                  # (17, 33)
    w4t = aug_hidden_t(w4, b4)                                  # (17, 17)
    wot = jnp.concatenate([wo, bo], axis=0).T                   # (1, 17)
    return w1t, b1t, w2t, w3t, w4t, wot


def _round_up(n, m):
    return ((n + m - 1) // m) * m


def net_forward(x, params, *, max_tile_b=2048):
    """Run the fused MLP kernel over the batch dimension.

    x:       (B, F) float32
    params:  dict with w1..w4, wo of shape (in, out) and b1..b4, bo of (1, out)
    returns: (B, 1) float32
    """
    B, F = x.shape
    w1t, b1t, w2t, w3t, w4t, wot = _augment_params(params)

    # Tile selection (no padding of x — ragged last tile is handled by the
    # pipeline's clipped DMAs):
    #   * B <= 512: a single grid step; block == full array so no alignment
    #     constraints apply.
    #   * B  > 512: lane-aligned (multiple of 128) tiles, capped at
    #     max_tile_b, chosen so the grid has >= 2 steps and both v7x
    #     TensorCores get work via the "parallel" dimension semantics.
    if B <= 512:
        tile_b = B
    else:
        tile_b = min(max_tile_b, _round_up(pl.cdiv(B, 2), 128))
    num_tiles = pl.cdiv(B, tile_b)

    def resident(arr):
        # Constant block index -> weight stays VMEM-resident, no per-step DMA.
        return pl.BlockSpec(arr.shape, lambda i: (0, 0))

    out = pl.pallas_call(
        _mlp_kernel,
        out_shape=jax.ShapeDtypeStruct((1, B), jnp.float32),
        grid=(num_tiles,),
        in_specs=[
            pl.BlockSpec((tile_b, F), lambda i: (i, 0)),   # x: tiled along batch
            resident(w1t), resident(b1t),
            resident(w2t), resident(w3t), resident(w4t), resident(wot),
        ],
        out_specs=pl.BlockSpec((1, tile_b), lambda i: (0, i)),
        compiler_params=pltpu.CompilerParams(
            dimension_semantics=("parallel",),
        ),
    )(x, w1t, b1t, w2t, w3t, w4t, wot)

    # (1, B) -> (B, 1): contiguous, zero-cost reshape.
    return out.reshape(B, 1)


def init_params(key, num_features):
    """Deterministic PyTorch-style init: U(-1/sqrt(fan_in), 1/sqrt(fan_in)).

    Weights stored as (in_features, out_features); biases as (1, out_features).
    """
    dims = [(num_features, 16), (16, 32), (32, 16), (16, 16), (16, 1)]
    names = ["1", "2", "3", "4", "o"]
    params = {}
    for (fan_in, fan_out), name in zip(dims, names):
        key, kw, kb = jax.random.split(key, 3)
        bound = 1.0 / jnp.sqrt(jnp.float32(fan_in))
        params[f"w{name}"] = jax.random.uniform(
            kw, (fan_in, fan_out), jnp.float32, -bound, bound)
        params[f"b{name}"] = jax.random.uniform(
            kb, (1, fan_out), jnp.float32, -bound, bound)
    return params


def net_forward_ref(x, params):
    """Pure-JAX reference (mirrors the PyTorch Net.forward)."""
    h = jnp.maximum(x @ params["w1"] + params["b1"], 0.0)
    h = jnp.maximum(h @ params["w2"] + params["b2"], 0.0)
    h = jnp.maximum(h @ params["w3"] + params["b3"], 0.0)
    h = jnp.maximum(h @ params["w4"] + params["b4"], 0.0)
    return h @ params["wo"] + params["bo"]


if __name__ == "__main__":
    key = jax.random.PRNGKey(0)
    k_params, k_x1, k_x2 = jax.random.split(key, 3)

    num_features = 12   # tabular predictor feature count

    params = init_params(k_params, num_features)

    # Small single-tile batch.
    x_small = jax.random.normal(k_x1, (16, num_features), jnp.float32)
    out_small = jax.block_until_ready(net_forward(x_small, params))
    ref_small = net_forward_ref(x_small, params)
    assert out_small.shape == (16, 1), out_small.shape
    assert jnp.allclose(out_small, ref_small, atol=1e-5, rtol=1e-5), \
        "small-batch mismatch vs reference"

    # Ragged multi-tile batch (exercises the no-pad partial-block path and the
    # >=2-tile grid used for v7x megacore sharding).
    x_big = jax.random.normal(k_x2, (700, num_features), jnp.float32)
    out_big = jax.block_until_ready(net_forward(x_big, params))
    ref_big = net_forward_ref(x_big, params)
    assert out_big.shape == (700, 1), out_big.shape
    assert jnp.allclose(out_big, ref_big, atol=1e-5, rtol=1e-5), \
        "ragged-batch mismatch vs reference"

    print("KERNEL_OK")
</pallas_src>

<mosaic_0001>
module attributes {stable_mosaic.version = 11 : i64} {
  func.func @_mlp_kernel(%arg0: i32, %arg1: memref<16x12xf32, #tpu.memory_space<vmem>>, %arg2: memref<17x12xf32, #tpu.memory_space<vmem>>, %arg3: memref<17x1xf32, #tpu.memory_space<vmem>>, %arg4: memref<33x17xf32, #tpu.memory_space<vmem>>, %arg5: memref<17x33xf32, #tpu.memory_space<vmem>>, %arg6: memref<17x17xf32, #tpu.memory_space<vmem>>, %arg7: memref<1x17xf32, #tpu.memory_space<vmem>>, %arg8: memref<1x16xf32, #tpu.memory_space<vmem>>) attributes {dimension_semantics = [#tpu.dimension_semantics<parallel>], iteration_bounds = array<i64: 1>, scalar_prefetch = 0 : i64, scratch_operands = 0 : i64, tpu.core_type = #tpu.core_type<tc>, window_params = [{transform_indices = @transform_0, window_bounds = array<i64: 16, 12>}, {pipeline_mode = #tpu.pipeline_mode<synchronous>, transform_indices = @transform_1, window_bounds = array<i64: 17, 12>}, {pipeline_mode = #tpu.pipeline_mode<synchronous>, transform_indices = @transform_2, window_bounds = array<i64: 17, 1>}, {pipeline_mode = #tpu.pipeline_mode<synchronous>, transform_indices = @transform_3, window_bounds = array<i64: 33, 17>}, {pipeline_mode = #tpu.pipeline_mode<synchronous>, transform_indices = @transform_4, window_bounds = array<i64: 17, 33>}, {pipeline_mode = #tpu.pipeline_mode<synchronous>, transform_indices = @transform_5, window_bounds = array<i64: 17, 17>}, {pipeline_mode = #tpu.pipeline_mode<synchronous>, transform_indices = @transform_6, window_bounds = array<i64: 1, 17>}, {transform_indices = @transform_7, window_bounds = array<i64: 1, 16>}]} {
    %c0 = arith.constant 0 : index
    %c0_0 = arith.constant 0 : index
    %0 = vector.load %arg1[%c0, %c0_0] : memref<16x12xf32, #tpu.memory_space<vmem>>, vector<16x12xf32>
    %c0_1 = arith.constant 0 : index
    %c0_2 = arith.constant 0 : index
    %1 = vector.load %arg2[%c0_1, %c0_2] : memref<17x12xf32, #tpu.memory_space<vmem>>, vector<17x12xf32>
    %cst = arith.constant dense<0.000000e+00> : vector<17x16xf32>
    %2 = tpu.matmul %1, %0, %cst {dimension_numbers = #tpu.dot_dimension_numbers<[1], [1], [0], [0], [0, 0, 1, 0], [], []>} : vector<17x12xf32>, vector<16x12xf32>, vector<17x16xf32> -> vector<17x16xf32>
    %c0_3 = arith.constant 0 : index
    %c0_4 = arith.constant 0 : index
    %3 = vector.load %arg3[%c0_3, %c0_4] : memref<17x1xf32, #tpu.memory_space<vmem>>, vector<17x1xf32>
    %4 = vector.broadcast %3 : vector<17x1xf32> to vector<17x16xf32>
    %5 = arith.addf %2, %4 : vector<17x16xf32>
    %cst_5 = arith.constant 0.000000e+00 : f32
    %6 = vector.broadcast %cst_5 : f32 to vector<17x16xf32>
    %7 = arith.maximumf %5, %6 : vector<17x16xf32>
    %c0_6 = arith.constant 0 : index
    %c0_7 = arith.constant 0 : index
    %8 = vector.load %arg4[%c0_6, %c0_7] : memref<33x17xf32, #tpu.memory_space<vmem>>, vector<33x17xf32>
    %cst_8 = arith.constant dense<0.000000e+00> : vector<33x16xf32>
    %9 = tpu.matmul %8, %7, %cst_8 {dimension_numbers = #tpu.dot_dimension_numbers<[1], [0], [0], [1], [0, 0, 1, 1], [], []>} : vector<33x17xf32>, vector<17x16xf32>, vector<33x16xf32> -> vector<33x16xf32>
    %cst_9 = arith.constant 0.000000e+00 : f32
    %10 = vector.broadcast %cst_9 : f32 to vector<33x16xf32>
    %11 = arith.maximumf %9, %10 : vector<33x16xf32>
    %c0_10 = arith.constant 0 : index
    %c0_11 = arith.constant 0 : index
    %12 = vector.load %arg5[%c0_10, %c0_11] : memref<17x33xf32, #tpu.memory_space<vmem>>, vector<17x33xf32>
    %cst_12 = arith.constant dense<0.000000e+00> : vector<17x16xf32>
    %13 = tpu.matmul %12, %11, %cst_12 {dimension_numbers = #tpu.dot_dimension_numbers<[1], [0], [0], [1], [0, 0, 1, 1], [], []>} : vector<17x33xf32>, vector<33x16xf32>, vector<17x16xf32> -> vector<17x16xf32>
    %cst_13 = arith.constant 0.000000e+00 : f32
    %14 = vector.broadcast %cst_13 : f32 to vector<17x16xf32>
    %15 = arith.maximumf %13, %14 : vector<17x16xf32>
    %c0_14 = arith.constant 0 : index
    %c0_15 = arith.constant 0 : index
    %16 = vector.load %arg6[%c0_14, %c0_15] : memref<17x17xf32, #tpu.memory_space<vmem>>, vector<17x17xf32>
    %cst_16 = arith.constant dense<0.000000e+00> : vector<17x16xf32>
    %17 = tpu.matmul %16, %15, %cst_16 {dimension_numbers = #tpu.dot_dimension_numbers<[1], [0], [0], [1], [0, 0, 1, 1], [], []>} : vector<17x17xf32>, vector<17x16xf32>, vector<17x16xf32> -> vector<17x16xf32>
    %cst_17 = arith.constant 0.000000e+00 : f32
    %18 = vector.broadcast %cst_17 : f32 to vector<17x16xf32>
    %19 = arith.maximumf %17, %18 : vector<17x16xf32>
    %c0_18 = arith.constant 0 : index
    %c0_19 = arith.constant 0 : index
    %20 = vector.load %arg7[%c0_18, %c0_19] : memref<1x17xf32, #tpu.memory_space<vmem>>, vector<1x17xf32>
    %cst_20 = arith.constant dense<0.000000e+00> : vector<1x16xf32>
    %21 = tpu.matmul %20, %19, %cst_20 {dimension_numbers = #tpu.dot_dimension_numbers<[1], [0], [0], [1], [0, 0, 1, 1], [], []>} : vector<1x17xf32>, vector<17x16xf32>, vector<1x16xf32> -> vector<1x16xf32>
    %c0_21 = arith.constant 0 : index
    %c0_22 = arith.constant 0 : index
    %22 = vector.load %arg8[%c0_21, %c0_22] : memref<1x16xf32, #tpu.memory_space<vmem>>, vector<1x16xf32>
    tpu.vector_store %arg8[%c0_21, %c0_22], %21 {strides = array<i32>} : memref<1x16xf32, #tpu.memory_space<vmem>>, vector<1x16xf32>,
    return
  }
  func.func @transform_0(%arg0: i32) -> (i32, i32) {
    %c0_i32 = arith.constant 0 : i32
    %c0_i32_0 = arith.constant 0 : i32
    return %arg0, %c0_i32 : i32, i32
  }
  func.func @transform_1(%arg0: i32) -> (i32, i32) {
    %c0_i32 = arith.constant 0 : i32
    %c0_i32_0 = arith.constant 0 : i32
    %c0_i32_1 = arith.constant 0 : i32
    return %c0_i32, %c0_i32_0 : i32, i32
  }
  func.func @transform_2(%arg0: i32) -> (i32, i32) {
    %c0_i32 = arith.constant 0 : i32
    %c0_i32_0 = arith.constant 0 : i32
    %c0_i32_1 = arith.constant 0 : i32
    return %c0_i32, %c0_i32_0 : i32, i32
  }
  func.func @transform_3(%arg0: i32) -> (i32, i32) {
    %c0_i32 = arith.constant 0 : i32
    %c0_i32_0 = arith.constant 0 : i32
    %c0_i32_1 = arith.constant 0 : i32
    return %c0_i32, %c0_i32_0 : i32, i32
  }
  func.func @transform_4(%arg0: i32) -> (i32, i32) {
    %c0_i32 = arith.constant 0 : i32
    %c0_i32_0 = arith.constant 0 : i32
    %c0_i32_1 = arith.constant 0 : i32
    return %c0_i32, %c0_i32_0 : i32, i32
  }
  func.func @transform_5(%arg0: i32) -> (i32, i32) {
    %c0_i32 = arith.constant 0 : i32
    %c0_i32_0 = arith.constant 0 : i32
    %c0_i32_1 = arith.constant 0 : i32
    return %c0_i32, %c0_i32_0 : i32, i32
  }
  func.func @transform_6(%arg0: i32) -> (i32, i32) {
    %c0_i32 = arith.constant 0 : i32
    %c0_i32_0 = arith.constant 0 : i32
    %c0_i32_1 = arith.constant 0 : i32
    return %c0_i32, %c0_i32_0 : i32, i32
  }
  func.func @transform_7(%arg0: i32) -> (i32, i32) {
    %c0_i32 = arith.constant 0 : i32
    %c0_i32_0 = arith.constant 0 : i32
    return %c0_i32, %arg0 : i32, i32
  }
}

</mosaic_0001>

<bundles_post_ra>
// kernel: tpu_custom_call.1
= control target key start
LH: loop header
LB: loop body
LE: loop exit
PB: predicated region body
PF: predicated region fallthrough
CT: control target
= control target key end

     0   :  { %vm50_vm0 = vcmask 97280   ;;  %v738_v2 = vmov 0.0|0.0   ;;  %vm739_vm2 = vmmov 0   ;;  %v740_v4 = vmov 0.0   ;;  %s913_s0 = inlined_call_operand.vmem [shape: f32[16,12], index: 0, kind: input, shape index: {}]   ;;  %s914_s1 = inlined_call_operand.vmem [shape: f32[17,12], index: 1, kind: input, shape index: {}]   ;;  %s915_s2 = inlined_call_operand.vmem [shape: f32[17,1], index: 2, kind: input, shape index: {}]   ;;  %s916_s3 = inlined_call_operand.vmem [shape: f32[33,17], index: 3, kind: input, shape index: {}]   ;;  %s917_s4 = inlined_call_operand.vmem [shape: f32[17,33], index: 4, kind: input, shape index: {}]   ;;  %s918_s5 = inlined_call_operand.vmem [shape: f32[17,17], index: 5, kind: input, shape index: {}]   ;;  %s919_s6 = inlined_call_operand.vmem [shape: f32[1,17], index: 6, kind: input, shape index: {}]   ;;  %s920_s7 = inlined_call_operand.hbm [shape: f32[1,16], index: 7, kind: output, shape index: {}]  }
   0x1   :  { %v27_v0 = vld [vmem:[%s913_s0] sm:$0xff]  ;;  %v28_v1 = vld [vmem:[%s913_s0 + $0x8] sm:$0xff]  ;;  %688 = vmatprep.subr.bf16.mxu0 %v738_v2  ;;  %vm690_vm1 = vmpackc.low %vm50_vm0, %vm50_vm0  ;;  %615 = vmatprep.mubr.msk.f32.mxu0 %vm739_vm2, %v740_v4  ;;  %v741_v5 = vmov 0  }
   0x2   :  { %v689_v3 = vpack.c.bf16 %v28_v1, %v27_v0  ;;  %712 = vset.pattern.permute.xlu0 %v741_v5  ;;  %v32_v6 = vld [vmem:[%s915_s2] sm:$0xff]  ;;  %713 = vset.pattern.permute.xlu1 %v741_v5  ;;  %v34_v7 = vld [vmem:[%s915_s2 + $0x10] sm:$0x1] }
   0x3   :  { %37 = vperm.xlu0 %712, %v32_v6  }
   0x4   :  { %691 = vmatpush3.bf16.xpose.msk.msra.mxu0 %vm690_vm1, %v689_v3 }
   0x5   :  { %12 = vsyncpa [#allocation3], 0  ;;  %v33_v8 = vld [vmem:[%s915_s2 + $0x8] sm:$0xff]  ;;  %47 = vperm.xlu1 %713, %v34_v7   ;;  %692 = vmatprep.subr.bf16.mxu1 %v738_v2  ;;  %v29_v9 = vld [vmem:[%s914_s1] sm:$0xff]  ;;  %vm170_vm3 = vcmask 1040384   ;;  %vm154_vm4 = vcmask 138240  }
   0x6   :  { %630 = vmatprep.mubr.msk.f32.mxu1 %vm739_vm2, %v740_v4  ;;  %695 = vmatprep.subr.bf16.mxu0 %v738_v2  ;;  %v30_v10 = vld [vmem:[%s914_s1 + $0x8] sm:$0xff]  ;;  %v31_v11 = vld [vmem:[%s914_s1 + $0x10] sm:$0x1]  ;;  %v149_v28 = vld [vmem:[%s916_s3] sm:$0xff]  ;;  %vm272_vm5 = vcmask 269312   ;;  %vm543_vm6 = vcmask 122880  }
   0x7   :  { %42 = vperm.xlu0 %712, %v33_v8   ;;  %v150_v29 = vld [vmem:[%s916_s3 + $0x8] sm:$0xff]  ;;  %v151_v30 = vld [vmem:[%s916_s3 + $0x10] sm:$0xff]  ;;  %v152_v31 = vld [vmem:[%s916_s3 + $0x18] sm:$0xff] }
   0x8   :  { %v153_v32 = vld [vmem:[%s916_s3 + $0x20] sm:$0x1]  ;;  %v270_v51 = vld [vmem:[%s917_s4 + $0x8] sm:$0xff]  ;;  %v271_v52 = vld [vmem:[%s917_s4 + $0x10] sm:$0x1] }
   0x9   :  { %v269_v50 = vld [vmem:[%s917_s4] sm:$0xff]  ;;  %v369_v0 = vld [vmem:[%s918_s5 + $0x8] sm:$0xff]  ;;  %v370_v1 = vld [vmem:[%s918_s5 + $0x10] sm:$0x1] }
   0xa   :  { %v368_v63 = vld [vmem:[%s918_s5] sm:$0xff]  ;;  %s742_s5 = smov [#allocation2]  }
   0xb   :  { %616 = vmatmul.mubr.msk.f32.vlgmr.msra.gmra.mrb[0].mxu0 %vm50_vm0, %v29_v9  ;;  %s551_s12 = sshll.u32 %s742_s5, 4  ;;  %s552_s12 = int_to_ptr.vmem [resolvable:$true] %s551_s12 }
   0xc   :  { %618 = vmatprep.mubr.msk.f32.mxu0 %vm739_vm2, %v740_v4  ;;  %s714_s2 = scalar_lea.vmem %s552_s12, 16  ;;  %s718_s13 = scalar_lea.vmem %s552_s12, 32 }
   0xd   :  { %p715_p0 = scmp.ne.s32.totalorder %s552_s12, %s714_s2  ;;  %p719_p1 = scmp.lt.s32.totalorder %s552_s12, %s552_s12 }
   0xe   :  { %p720_p2 = scmp.lt.s32.totalorder %s718_s13, %s714_s2 }
   0xf   :  { %619 = vmatmul.mubr.msk.f32.gmra.mrb[2].mxu0 %vm50_vm0, %v30_v10 }
  0x10   :  { %621 = vmatprep.mubr.msk.f32.mxu0 %vm739_vm2, %v740_v4  ;;  %p721_p3 = por %p720_p2, %p719_p1 }
  0x12   :  { %p722_p4 = pnand %p721_p3, %p715_p0 }
  0x13   :  { %622 = vmatmul.mubr.msk.f32.gmra.mrb[4].mxu0 %vm50_vm0, %v31_v11 }
  0x14   :  { %655 = vmatprep.mubr.msk.f32.mxu0 %vm739_vm2, %v740_v4 }
  0x82   :  { %v38_v12 = vpop.permute.xlu0 %37 }
  0x84   :  { %v48_v20 = vpop.permute.xlu1 %47 }
  0x86   :  { %v43_v16 = vpop.permute.xlu0 %42 }
  0xde   :  { %v132_v13 = vpop.f32.mrb[0].mxu0 }
  0xdf   :  { %v617_v14 = vpop.f32.mrb[1].mxu0  ;;  %v133_v15 = vadd.f32 %v132_v13, %v38_v12  ;;  %v466_v13 = vld [vmem:[%s919_s6] sm:$0x1] }
  0xe1   :  { %v146_v21 = vmax.f32 %v133_v15, 0.0 }
  0xe2   :  { %v137_v17 = vpop.f32.mrb[2].mxu0 }
  0xe3   :  { %v138_v18 = vadd.f32 %v137_v17, %v43_v16  ;;  %v620_v19 = vpop.f32.mrb[3].mxu0 }
  0xe5   :  { %v147_v22 = vmax.f32 %v138_v18, 0.0 }
  0xe6   :  { %v142_v23 = vpop.f32.mrb[4].mxu0 }
  0xe7   :  { %v143_v24 = vadd.f32 %v142_v23, %v48_v20  ;;  %v623_v25 = vpop.f32.mrb[5].mxu0  ;;  %v693_v26 = vpack.c.bf16 %v147_v22, %v146_v21 }
  0xe9   :  { %v148_v27 = vmax.f32 %v143_v24, 0.0  ;;  %694 = vmatpush3.bf16.msra.mxu1 %v693_v26 }
  0xea   :  { %628 = vmatprep.subr.mxu1 %v740_v4 }
  0xed   :  { %629 = vmatpush3.msk.msra.mxu1 %vm170_vm3, %v148_v27 }
  0xee   :  { %631 = vmatmul.mubr.msk.f32.vlgmr.msra.gmra.mrb[0].mxu1 %vm154_vm4, %v149_v28  ;;  %701 = vmatprep.subr.bf16.mxu1 %v738_v2 }
  0xef   :  { %633 = vmatprep.mubr.msk.f32.mxu1 %vm739_vm2, %v740_v4 }
  0xf2   :  { %634 = vmatmul.mubr.msk.f32.gmra.mrb[2].mxu1 %vm154_vm4, %v150_v29 }
  0xf3   :  { %636 = vmatprep.mubr.msk.f32.mxu1 %vm739_vm2, %v740_v4 }
  0xf6   :  { %637 = vmatmul.mubr.msk.f32.gmra.mrb[4].mxu1 %vm154_vm4, %v151_v30 }
  0xf7   :  { %639 = vmatprep.mubr.msk.f32.mxu1 %vm739_vm2, %v740_v4 }
  0xfa   :  { %640 = vmatmul.mubr.msk.f32.gmra.mrb[6].mxu1 %vm154_vm4, %v152_v31 }
  0xfb   :  { %642 = vmatprep.mubr.msk.f32.mxu1 %vm739_vm2, %v740_v4 }
  0xfe   :  { %643 = vmatmul.mubr.msk.f32.gmra.mrb[8].mxu1 %vm154_vm4, %v153_v32 }
  0xff   :  { %670 = vmatprep.mubr.msk.f32.mxu1 %vm739_vm2, %v740_v4 }
 0x1c1   :  { %v240_v33 = vpop.f32.mrb[0].mxu1 }
 0x1c2   :  { %v632_v34 = vpop.f32.mrb[1].mxu1  ;;  %v264_v36 = vmax.f32 %v240_v33, 0.0 }
 0x1c5   :  { %v245_v35 = vpop.f32.mrb[2].mxu1 }
 0x1c6   :  { %v265_v37 = vmax.f32 %v245_v35, 0.0  ;;  %v635_v38 = vpop.f32.mrb[3].mxu1 }
 0x1c8   :  { %v696_v39 = vpack.c.bf16 %v265_v37, %v264_v36 }
 0x1c9   :  { %v250_v40 = vpop.f32.mrb[4].mxu1 }
 0x1ca   :  { %v638_v41 = vpop.f32.mrb[5].mxu1  ;;  %697 = vmatpush3.bf16.msra.mxu0 %v696_v39  ;;  %v266_v43 = vmax.f32 %v250_v40, 0.0 }
 0x1cb   :  { %698 = vmatprep.subr.bf16.mxu0 %v738_v2 }
 0x1cd   :  { %v255_v42 = vpop.f32.mrb[6].mxu1 }
 0x1ce   :  { %v267_v44 = vmax.f32 %v255_v42, 0.0  ;;  %v641_v45 = vpop.f32.mrb[7].mxu1 }
 0x1d0   :  { %v699_v46 = vpack.c.bf16 %v267_v44, %v266_v43 }
 0x1d1   :  { %v260_v47 = vpop.f32.mrb[8].mxu1 }
 0x1d2   :  { %v268_v48 = vmax.f32 %v260_v47, 0.0  ;;  %700 = vmatpush3.bf16.msra.mxu0 %v699_v46  ;;  %v644_v49 = vpop.f32.mrb[9].mxu1 }
 0x1d3   :  { %653 = vmatprep.subr.mxu0 %v740_v4 }
 0x1d6   :  { %654 = vmatpush3.msk.msra.mxu0 %vm170_vm3, %v268_v48 }
 0x1d7   :  { %656 = vmatmul.mubr.msk.f32.vlgmr.msra.gmra.mrb[6].mxu0 %vm272_vm5, %v269_v50  ;;  %704 = vmatprep.subr.bf16.mxu0 %v738_v2 }
 0x1d8   :  { %658 = vmatprep.mubr.msk.f32.mxu0 %vm739_vm2, %v740_v4 }
 0x1db   :  { %659 = vmatmul.mubr.msk.f32.gmra.mrb[8].mxu0 %vm272_vm5, %v270_v51 }
 0x1dc   :  { %661 = vmatprep.mubr.msk.f32.mxu0 %vm739_vm2, %v740_v4 }
 0x1df   :  { %662 = vmatmul.mubr.msk.f32.gmra.mrb[10].mxu0 %vm272_vm5, %v271_v52 }
 0x1e0   :  { %685 = vmatprep.mubr.msk.f32.mxu0 %vm739_vm2, %v740_v4 }
 0x2aa   :  { %v351_v53 = vpop.f32.mrb[6].mxu0 }
 0x2ab   :  { %v657_v54 = vpop.f32.mrb[7].mxu0  ;;  %v365_v56 = vmax.f32 %v351_v53, 0.0 }
 0x2ae   :  { %v356_v55 = vpop.f32.mrb[8].mxu0 }
 0x2af   :  { %v366_v57 = vmax.f32 %v356_v55, 0.0  ;;  %v660_v58 = vpop.f32.mrb[9].mxu0 }
 0x2b1   :  { %v702_v59 = vpack.c.bf16 %v366_v57, %v365_v56 }
 0x2b2   :  { %v361_v60 = vpop.f32.mrb[10].mxu0 }
 0x2b3   :  { %703 = vmatpush3.bf16.msra.mxu1 %v702_v59  ;;  %v367_v61 = vmax.f32 %v361_v60, 0.0  ;;  %v663_v62 = vpop.f32.mrb[11].mxu0 }
 0x2b4   :  { %668 = vmatprep.subr.mxu1 %v740_v4 }
 0x2b7   :  { %669 = vmatpush3.msk.msra.mxu1 %vm170_vm3, %v367_v61 }
 0x2b8   :  { %671 = vmatmul.mubr.msk.f32.vlgmr.msra.gmra.mrb[10].mxu1 %vm154_vm4, %v368_v63 }
 0x2b9   :  { %673 = vmatprep.mubr.msk.f32.mxu1 %vm739_vm2, %v740_v4 }
 0x2bc   :  { %674 = vmatmul.mubr.msk.f32.gmra.mrb[12].mxu1 %vm154_vm4, %v369_v0 }
 0x2bd   :  { %676 = vmatprep.mubr.msk.f32.mxu1 %vm739_vm2, %v740_v4 }
 0x2c0   :  { %677 = vmatmul.mubr.msk.f32.gmra.mrb[14].mxu1 %vm154_vm4, %v370_v1 }
 0x38b   :  { %v449_v2 = vpop.f32.mrb[10].mxu1 }
 0x38c   :  { %v672_v3 = vpop.f32.mrb[11].mxu1  ;;  %v463_v6 = vmax.f32 %v449_v2, 0.0 }
 0x38f   :  { %v454_v5 = vpop.f32.mrb[12].mxu1 }
 0x390   :  { %v464_v7 = vmax.f32 %v454_v5, 0.0  ;;  %v675_v8 = vpop.f32.mrb[13].mxu1 }
 0x392   :  { %v705_v9 = vpack.c.bf16 %v464_v7, %v463_v6 }
 0x393   :  { %v459_v10 = vpop.f32.mrb[14].mxu1 }
 0x394   :  { %706 = vmatpush3.bf16.msra.mxu0 %v705_v9  ;;  %v465_v11 = vmax.f32 %v459_v10, 0.0  ;;  %v678_v12 = vpop.f32.mrb[15].mxu1 }
 0x395   :  { %683 = vmatprep.subr.mxu0 %v740_v4 }
 0x398   :  { %684 = vmatpush3.msk.msra.mxu0 %vm170_vm3, %v465_v11 }
 0x399   :  { %686 = vmatmul.mubr.msk.f32.vlgmr.msra.gmra.mrb[12].mxu0 %vm154_vm4, %v466_v13 }
 0x46c   :  { %v539_v14 = vpop.f32.mrb[12].mxu0 }
 0x46d   :  { %544 = vst.msk [vmem:[#allocation2] sm:$0x1] %vm543_vm6, %v539_v14  ;;  %v687_v15 = vpop.f32.mrb[13].mxu0 }
 0x46e   :  { %725 = shalt.err (!%p722_p4)
}
 0x46f   :  { %s726_s1 = scalar_lea.hbm %s920_s7, 16 }
 0x470   :  { %p727_p5 = scmp.ne.s32.totalorder %s920_s7, %s726_s1  ;;  %p730_p6 = scmp.lt.u32.totalorder %s726_s1, %s920_s7 }
 0x472   :  { %p732_p7 = pnand %p730_p6, %p727_p5 }
 0x474   :  { %735 = shalt.err (!%p732_p7)
}
 0x475   :  { %554 = dma.vmem_to_hbm [thread:$0]  %s552_s12, 16, %s920_s7, [#allocation3]  }
 0x476   :  { %736 = dma.done.wait [#allocation3], 16  }
 0x477   :  { %737 = vsyncadd [#allocation3], 4294967280 }
 0x478   :  { %558 = vsyncpa [#allocation3], 1 }

</bundles_post_ra>
